<compile_context>
chip_gen: v5e
topology: v5e:2x2
jax: 0.10.0
libtpu: 0.0.40
codegen_flags: <defaults>
</compile_context>

<pallas_src>
import functools

import jax
import jax.numpy as jnp
from jax import lax
from jax.experimental import pallas as pl
from jax.experimental.pallas import tpu as pltpu


def _round_up(x, m):
    return (x + m - 1) // m * m


def _cdiv(a, b):
    return (a + b - 1) // b


def _pick_tile(dim, max_tile, align):
    """Largest roughly-balanced tile <= max_tile, `align`-aligned, minimal padding."""
    dim_a = _round_up(dim, align)
    if dim_a <= max_tile:
        return dim_a
    n_blocks = _cdiv(dim_a, max_tile)
    return _round_up(_cdiv(dim_a, n_blocks), align)


def linear_kernel(x_ref, wt_ref, b_ref, o_ref, *, precision):
    # x_ref: (tm, tk); wt_ref: (tk, tn) [weights pre-transposed to (K, N)];
    # b_ref: (1, tn); o_ref: (tm, tn) f32 — its block index is k-invariant, so
    # it stays resident in VMEM across the K axis and acts as the accumulator.
    k = pl.program_id(2)

    @pl.when(k == 0)
    def _():
        # Initialize the resident output tile with the broadcast bias once.
        o_ref[...] = jnp.broadcast_to(b_ref[...], o_ref.shape).astype(o_ref.dtype)

    # Native (1,),(0,) contraction: MXU consumes both tiles without transposes.
    o_ref[...] += jnp.dot(
        x_ref[...],
        wt_ref[...],
        preferred_element_type=jnp.float32,
        precision=precision,
    )


@functools.partial(
    jax.jit, static_argnames=("tm", "tn", "tk", "compute_dtype", "precision"))
def linear_forward(x, w, b, *, tm=512, tn=1024, tk=512,
                   compute_dtype=None, precision=None):
    """y = x @ w.T + b  (torch.addmm(b, x, w.T)). Output is float32.

    x: (M, K), w: (N, K) [nn.Linear layout], b: (N,).
    compute_dtype: optional (e.g. jnp.bfloat16) dtype for the MXU operands;
    accumulation stays float32.
    """
    M, K = x.shape
    N, K_w = w.shape
    assert K == K_w and b.shape == (N,)

    # ---- tile selection (balanced, (8,128)-aligned, minimal padding) ----
    tm = _pick_tile(M, tm, 8)
    tn = _pick_tile(N, tn, 128)
    tk = _pick_tile(K, tk, 128)

    M_p = _round_up(M, tm)
    N_p = _round_up(N, tn)
    K_p = _round_up(K, tk)

    # v7x has 2 TensorCores: if there would be a single (M, N) output block,
    # split N so both cores have work along a "parallel" axis.
    if (M_p // tm) * (N_p // tn) == 1 and tn > 128:
        tn = _round_up(tn // 2, 128)
        N_p = _round_up(N, tn)

    grid = (M_p // tm, N_p // tn, K_p // tk)
    m_blocks, n_blocks, k_blocks = grid

    # ---- operand preparation (pad only what is actually unaligned) ----
    # K padding (zeros) is the only padding required for reduction correctness;
    # M/N padding only happens when those dims are not tile multiples.
    x_p = x
    if (M_p, K_p) != (M, K):
        x_p = jnp.pad(x, ((0, M_p - M), (0, K_p - K)))
    wt = w.T  # one-time (K, N) re-layout: kernel never transposes per tile
    wt_p = wt
    if (K_p, N_p) != (K, N):
        wt_p = jnp.pad(wt, ((0, K_p - K), (0, N_p - N)))
    b_p = b.astype(jnp.float32)
    if N_p != N:
        b_p = jnp.pad(b_p, (0, N_p - N))
    b_p = b_p.reshape(1, N_p)

    if compute_dtype is not None:
        x_p = x_p.astype(compute_dtype)
        wt_p = wt_p.astype(compute_dtype)

    in_item = jnp.dtype(compute_dtype).itemsize if compute_dtype is not None \
        else jnp.dtype(x.dtype).itemsize

    # ---- VMEM budget: double-buffered x/w/out tiles (+ tiny bias) ----
    needed = (2 * (tm * tk + tk * tn) * in_item
              + 2 * tm * tn * 4            # f32 output/accumulator tiles
              + 2 * tn * 4)                # bias tiles
    try:
        phys = getattr(pltpu.get_tpu_info(), "vmem_capacity_bytes",
                       64 * 1024 * 1024)
    except Exception:  # pragma: no cover - conservative fallback
        phys = 64 * 1024 * 1024
    vmem_limit = int(min(max(needed + (8 << 20), 32 << 20), int(phys * 0.9)))

    # ---- cost estimate with the tiled re-read factor ----
    cost = pl.CostEstimate(
        flops=2 * M_p * K_p * N_p,
        transcendentals=0,
        bytes_accessed=(M_p * K_p * n_blocks * in_item     # x re-read per N tile
                        + K_p * N_p * m_blocks * in_item   # w re-read per M tile
                        + M_p * N_p * 4 + N_p * 4),
    )

    out_p = pl.pallas_call(
        functools.partial(linear_kernel, precision=precision),
        out_shape=jax.ShapeDtypeStruct((M_p, N_p), jnp.float32),
        grid_spec=pltpu.PrefetchScalarGridSpec(
            num_scalar_prefetch=0,
            grid=grid,
            in_specs=[
                pl.BlockSpec((tm, tk), lambda i, j, k: (i, k)),
                pl.BlockSpec((tk, tn), lambda i, j, k: (k, j)),
                # Bias depends only on j -> stays resident across the K axis.
                pl.BlockSpec((1, tn), lambda i, j, k: (0, j)),
            ],
            out_specs=pl.BlockSpec((tm, tn), lambda i, j, k: (i, j)),
        ),
        compiler_params=pltpu.CompilerParams(
            dimension_semantics=("parallel", "parallel", "arbitrary"),
            vmem_limit_bytes=vmem_limit,
        ),
        cost_estimate=cost,
    )(x_p, wt_p, b_p)

    if (M_p, N_p) != (M, N):
        return out_p[:M, :N]
    return out_p


# TODO(synk): backward() / get_param() (gradient state) are not part of the
# forward pass and are not implemented here.


if __name__ == "__main__":
    key = jax.random.PRNGKey(0)
    ks = jax.random.split(key, 9)

    # 1) Small case matching the module's typical usage (N(0,1) init like the
    #    PyTorch module's .normal_(mean=0, std=1)).
    batch, input_dim, output_dim = 8, 32, 16
    x = jax.random.normal(ks[0], (batch, input_dim), dtype=jnp.float32)
    w = jax.random.normal(ks[1], (output_dim, input_dim), dtype=jnp.float32)
    b = jax.random.normal(ks[2], (output_dim,), dtype=jnp.float32)
    y = jax.block_until_ready(linear_forward(x, w, b))
    y_ref = x @ w.T + b
    assert y.shape == (batch, output_dim)
    assert jnp.allclose(y, y_ref, atol=1e-4, rtol=1e-4), float(
        jnp.max(jnp.abs(y - y_ref)))

    # 2) Unaligned-K case (K padded in wrapper, N split for 2 parallel blocks).
    M2, K2, N2 = 512, 320, 256
    x2 = jax.random.normal(ks[3], (M2, K2), dtype=jnp.float32)
    w2 = jax.random.normal(ks[4], (N2, K2), dtype=jnp.float32)
    b2 = jax.random.normal(ks[5], (N2,), dtype=jnp.float32)
    y2 = jax.block_until_ready(linear_forward(x2, w2, b2))
    y2_ref = x2 @ w2.T + b2
    assert y2.shape == (M2, N2)
    assert jnp.allclose(y2, y2_ref, atol=1e-2, rtol=1e-2), float(
        jnp.max(jnp.abs(y2 - y2_ref)))

    # 3) Multi-M-tile / multi-K-step case (exercises bias init at k==0 and the
    #    resident-output accumulation across the K axis; no padding needed).
    M3, K3, N3 = 1024, 1024, 384
    x3 = jax.random.normal(ks[6], (M3, K3), dtype=jnp.float32)
    w3 = jax.random.normal(ks[7], (N3, K3), dtype=jnp.float32)
    b3 = jax.random.normal(ks[8], (N3,), dtype=jnp.float32)
    y3 = jax.block_until_ready(linear_forward(x3, w3, b3))
    y3_ref = x3 @ w3.T + b3
    assert y3.shape == (M3, N3)
    assert jnp.allclose(y3, y3_ref, atol=2e-2, rtol=2e-2), float(
        jnp.max(jnp.abs(y3 - y3_ref)))

    # 4) bf16 compute path (f32 accumulation) — looser tolerance by design.
    y2b = jax.block_until_ready(
        linear_forward(x2, w2, b2, compute_dtype=jnp.bfloat16))
    assert y2b.shape == (M2, N2)
    assert jnp.allclose(y2b, y2_ref, atol=5e-1, rtol=5e-2), float(
        jnp.max(jnp.abs(y2b - y2_ref)))

    print("KERNEL_OK")
</pallas_src>

<mosaic_0001>
module attributes {stable_mosaic.version = 11 : i64} {
  func.func @linear_kernel(%arg0: i32, %arg1: i32, %arg2: i32, %arg3: memref<8x128xf32, #tpu.memory_space<vmem>>, %arg4: memref<128x128xf32, #tpu.memory_space<vmem>>, %arg5: memref<1x128xf32, #tpu.memory_space<vmem>>, %arg6: memref<8x128xf32, #tpu.memory_space<vmem>>) attributes {dimension_semantics = [#tpu.dimension_semantics<parallel>, #tpu.dimension_semantics<parallel>, #tpu.dimension_semantics<arbitrary>], iteration_bounds = array<i64: 1, 1, 1>, scalar_prefetch = 0 : i64, scratch_operands = 0 : i64, tpu.core_type = #tpu.core_type<tc>, window_params = [{transform_indices = @transform_0, window_bounds = array<i64: 8, 128>}, {transform_indices = @transform_1, window_bounds = array<i64: 128, 128>}, {transform_indices = @transform_2, window_bounds = array<i64: 1, 128>}, {transform_indices = @transform_3, window_bounds = array<i64: 8, 128>}]} {
    %c0_i32 = arith.constant 0 : i32
    %0 = arith.cmpi eq, %arg2, %c0_i32 : i32
    %1 = arith.extui %0 : i1 to i32
    %c0_i32_0 = arith.constant 0 : i32
    %2 = arith.cmpi ne, %1, %c0_i32_0 : i32
    scf.if %2 {
      %c0_8 = arith.constant 0 : index
      %c0_9 = arith.constant 0 : index
      %9 = vector.load %arg5[%c0_8, %c0_9] : memref<1x128xf32, #tpu.memory_space<vmem>>, vector<1x128xf32>
      %10 = vector.shape_cast %9 : vector<1x128xf32> to vector<1x128xf32>
      %11 = vector.broadcast %10 : vector<1x128xf32> to vector<8x128xf32>
      %c0_10 = arith.constant 0 : index
      %c0_11 = arith.constant 0 : index
      %12 = vector.load %arg6[%c0_10, %c0_11] : memref<8x128xf32, #tpu.memory_space<vmem>>, vector<8x128xf32>
      tpu.vector_store %arg6[%c0_10, %c0_11], %11 {strides = array<i32>} : memref<8x128xf32, #tpu.memory_space<vmem>>, vector<8x128xf32>,
    } else {
    }
    %c0 = arith.constant 0 : index
    %c0_1 = arith.constant 0 : index
    %3 = vector.load %arg6[%c0, %c0_1] : memref<8x128xf32, #tpu.memory_space<vmem>>, vector<8x128xf32>
    %c0_2 = arith.constant 0 : index
    %c0_3 = arith.constant 0 : index
    %4 = vector.load %arg3[%c0_2, %c0_3] : memref<8x128xf32, #tpu.memory_space<vmem>>, vector<8x128xf32>
    %c0_4 = arith.constant 0 : index
    %c0_5 = arith.constant 0 : index
    %5 = vector.load %arg4[%c0_4, %c0_5] : memref<128x128xf32, #tpu.memory_space<vmem>>, vector<128x128xf32>
    %cst = arith.constant dense<0.000000e+00> : vector<8x128xf32>
    %6 = tpu.matmul %4, %5, %cst {dimension_numbers = #tpu.dot_dimension_numbers<[1], [0], [0], [1], [0, 0, 1, 1], [], []>} : vector<8x128xf32>, vector<128x128xf32>, vector<8x128xf32> -> vector<8x128xf32>
    %7 = arith.addf %3, %6 : vector<8x128xf32>
    %c0_6 = arith.constant 0 : index
    %c0_7 = arith.constant 0 : index
    %8 = vector.load %arg6[%c0_6, %c0_7] : memref<8x128xf32, #tpu.memory_space<vmem>>, vector<8x128xf32>
    tpu.vector_store %arg6[%c0_6, %c0_7], %7 {strides = array<i32>} : memref<8x128xf32, #tpu.memory_space<vmem>>, vector<8x128xf32>,
    return
  }
  func.func @transform_0(%arg0: i32, %arg1: i32, %arg2: i32) -> (i32, i32) {
    %c0_i32 = arith.constant 0 : i32
    return %arg0, %arg2 : i32, i32
  }
  func.func @transform_1(%arg0: i32, %arg1: i32, %arg2: i32) -> (i32, i32) {
    %c0_i32 = arith.constant 0 : i32
    return %arg2, %arg1 : i32, i32
  }
  func.func @transform_2(%arg0: i32, %arg1: i32, %arg2: i32) -> (i32, i32) {
    %c0_i32 = arith.constant 0 : i32
    %c0_i32_0 = arith.constant 0 : i32
    return %c0_i32, %arg1 : i32, i32
  }
  func.func @transform_3(%arg0: i32, %arg1: i32, %arg2: i32) -> (i32, i32) {
    %c0_i32 = arith.constant 0 : i32
    return %arg0, %arg1 : i32, i32
  }
}

</mosaic_0001>

<bundles_post_ra>
// kernel: linear_forward.1
= control target key start
LH: loop header
LB: loop body
LE: loop exit
PB: predicated region body
PF: predicated region fallthrough
CT: control target
= control target key end

     0   :  { %s186_s0 = inlined_call_operand.vmem [shape: f32[8,128], index: 0, kind: input, shape index: {}]   ;;  %s187_s1 = inlined_call_operand.vmem [shape: f32[128,128], index: 1, kind: input, shape index: {}]   ;;  %s188_s2 = inlined_call_operand.vmem [shape: f32[1,128], index: 2, kind: input, shape index: {}]   ;;  %s189_s3 = inlined_call_operand.hbm [shape: f32[8,128], index: 3, kind: output, shape index: {}]  }
   0x1   :  { %v41_v0 = vld [vmem:[%s187_s1 + $0x78] sm:$0xff]  ;;  %v40_v1 = vld [vmem:[%s187_s1 + $0x70] sm:$0xff]  ;;  %v39_v2 = vld [vmem:[%s187_s1 + $0x68] sm:$0xff] }
   0x2   :  { %42 = vmatpush.msra.mxu0 %v41_v0  ;;  %v38_v3 = vld [vmem:[%s187_s1 + $0x60] sm:$0xff]  ;;  %v37_v4 = vld [vmem:[%s187_s1 + $0x58] sm:$0xff] }
   0x4   :  { %43 = vmatpush.msra.mxu0 %v40_v1 }
   0x6   :  { %44 = vmatpush.msra.mxu0 %v39_v2 }
   0x7   :  { %8 = vsyncpa [#allocation3], 0  ;;  %v36_v5 = vld [vmem:[%s187_s1 + $0x50] sm:$0xff]  ;;  %v35_v6 = vld [vmem:[%s187_s1 + $0x48] sm:$0xff]  ;;  %s108_s21 = smov [#allocation2]   ;;  %s71_s25 = sshll.u32 %s189_s3, 4  ;;  %s72_s25 = int_to_ptr.hbm [resolvable:$true] %s71_s25 }
   0x8   :  { %45 = vmatpush.msra.mxu0 %v38_v3  ;;  %v34_v7 = vld [vmem:[%s187_s1 + $0x40] sm:$0xff]  ;;  %v33_v8 = vld [vmem:[%s187_s1 + $0x38] sm:$0xff]  ;;  %v32_v9 = vld [vmem:[%s187_s1 + $0x30] sm:$0xff]  ;;  %s69_s22 = sshll.u32 %s108_s21, 4  ;;  %s70_s22 = int_to_ptr.vmem [resolvable:$true] %s69_s22 }
   0x9   :  { %v31_v10 = vld [vmem:[%s187_s1 + $0x28] sm:$0xff]  ;;  %v30_v11 = vld [vmem:[%s187_s1 + $0x20] sm:$0xff]  ;;  %v29_v12 = vld [vmem:[%s187_s1 + $0x18] sm:$0xff] }
   0xa   :  { %46 = vmatpush.msra.mxu0 %v37_v4  ;;  %v28_v13 = vld [vmem:[%s187_s1 + $0x10] sm:$0xff]  ;;  %v27_v14 = vld [vmem:[%s187_s1 + $0x8] sm:$0xff]  ;;  %v26_v15 = vld [vmem:[%s187_s1] sm:$0xff] }
   0xb   :  { %v25_v16 = vld [vmem:[%s186_s0] sm:$0xff] }
   0xc   :  { %47 = vmatpush.msra.mxu0 %v36_v5  ;;  %v81_v17 = vld [vmem:[%s188_s2] ss:$0 sm:$0xff] }
   0xe   :  { %48 = vmatpush.msra.mxu0 %v35_v6 }
  0x10   :  { %49 = vmatpush.msra.mxu0 %v34_v7 }
  0x12   :  { %50 = vmatpush.msra.mxu0 %v33_v8 }
  0x14   :  { %51 = vmatpush.msra.mxu0 %v32_v9 }
  0x16   :  { %52 = vmatpush.msra.mxu0 %v31_v10 }
  0x18   :  { %53 = vmatpush.msra.mxu0 %v30_v11 }
  0x1a   :  { %54 = vmatpush.msra.mxu0 %v29_v12 }
  0x1c   :  { %55 = vmatpush.msra.mxu0 %v28_v13 }
  0x1e   :  { %56 = vmatpush.msra.mxu0 %v27_v14 }
  0x20   :  { %57 = vmatpush.msra.mxu0 %v26_v15 }
  0x21   :  { %58 = vmatmul.f32.vlgmr.msra.gmra.mxu0 %v25_v16 }
  0x9e   :  { %v59_v18 = vpop.f32.mrf.mxu0 }
  0x9f   :  { %v62_v19 = vadd.f32 %v81_v17, %v59_v18 }
  0xa1   :  { %63 = vst [vmem:[#allocation2] sm:$0xff] %v62_v19 }
  0xa2   :  { %74 = dma.vmem_to_hbm [thread:$0]  %s70_s22, 128, %s72_s25, [#allocation3]  }
  0xa3   :  { %106 = dma.done.wait [#allocation3], 128  }
  0xa4   :  { %107 = vsyncadd [#allocation3], 4294967168 }
  0xa5   :  { %79 = vsyncpa [#allocation3], 1 }

</bundles_post_ra>
